<compile_context>
chip_gen: v6e
topology: v6e:2x2x1
jax: 0.10.0
libtpu: 0.0.40
codegen_flags: <defaults>
</compile_context>

<pallas_src>
import functools

import jax
import jax.numpy as jnp
from jax.experimental import pallas as pl
from jax.experimental.pallas import tpu as pltpu

K = 3                     # conv kernel size
NUM_LAYERS = 3            # conv layers in the head
HALO = NUM_LAYERS * (K // 2)   # 3 columns of halo per tile side


def _conv3_same(x, w_ref, b_ref):
    """k=3 'valid' conv over a haloed window: x (C_in, W) -> (C_out, W-2) f32.

    x is already in the MXU compute dtype (bf16).  Accumulation is f32.
    Weight ref is either (C_out, 3*C_in) [taps fused, small channels] or
    (3, C_out, C_in) [one matmul per tap, wide channels]; decided statically
    by its rank.
    """
    w_out = x.shape[-1] - 2
    xl = x[:, 0:w_out]          # taps at t-1
    xc = x[:, 1:w_out + 1]      # taps at t
    xr = x[:, 2:w_out + 2]      # taps at t+1
    if len(w_ref.shape) == 2:
        # Small contraction depth: fill the MXU with one 3x-deep matmul and
        # drop the two (C_out, W) VPU adds.
        x_cat = jnp.concatenate([xl, xc, xr], axis=0)        # (3*C_in, W-2)
        acc = jnp.dot(w_ref[...], x_cat, preferred_element_type=jnp.float32)
    else:
        acc = jnp.dot(w_ref[0], xl, preferred_element_type=jnp.float32)
        acc = acc + jnp.dot(w_ref[1], xc, preferred_element_type=jnp.float32)
        acc = acc + jnp.dot(w_ref[2], xr, preferred_element_type=jnp.float32)
    return acc + b_ref[...]     # bias broadcast (C_out, 1), f32


def _reg_head_kernel(x_ref, w1_ref, b1_ref, w2_ref, b2_ref, w3_ref, b3_ref,
                     out_ref, *, seq_len, tile_t, compute_dtype):
    # x_ref:   (1, 1, C_in, tile_t + 6)  haloed input window (zero-padded x)
    # wN_ref:  (C_out, 3*C_in) fused  OR  (3, C_out, C_in) per-tap, bf16
    # bN_ref:  (C_out, 1) f32
    # out_ref: (1, O, tile_t)
    t0 = pl.program_id(1) * tile_t      # global position of output column 0

    def edge_mask(width, global_start):
        # Columns outside [0, seq_len) are PyTorch's per-layer zero padding.
        pos = global_start + jax.lax.broadcasted_iota(jnp.int32, (1, width), 1)
        return (pos >= 0) & (pos < seq_len)

    x = x_ref[0, 0].astype(compute_dtype)                       # (C_in, T+6)

    h1 = jnp.maximum(_conv3_same(x, w1_ref, b1_ref), 0.0)       # (D, T+4) f32
    h1 = jnp.where(edge_mask(tile_t + 4, t0 - 2), h1, 0.0).astype(compute_dtype)

    h2 = jnp.maximum(_conv3_same(h1, w2_ref, b2_ref), 0.0)      # (D, T+2) f32
    h2 = jnp.where(edge_mask(tile_t + 2, t0 - 1), h2, 0.0).astype(compute_dtype)

    out_ref[0] = _conv3_same(h2, w3_ref, b3_ref).astype(out_ref.dtype)


def pt_transformer_reg_head(x_bct, params, *, tile_t=None,
                            fuse_taps_max_cin=128,
                            compute_dtype=jnp.bfloat16):
    """ActionFormer regression head forward.

    x_bct:  (B, C_in, T) float32, PyTorch NCW layout.
    params: ((w1, b1), (w2, b2), (w3, b3)) with PyTorch Conv1d layouts
            wN (C_out, C_in, K), bN (C_out,).
    Returns (B, O, T) float32.
    """
    (w1, b1), (w2, b2), (w3, b3) = params
    B, C_in, T = x_bct.shape
    D = w1.shape[0]
    O = w3.shape[0]
    assert w1.shape == (D, C_in, K) and w2.shape == (D, D, K), (w1.shape, w2.shape)
    assert w3.shape == (O, D, K), w3.shape

    # ---- T tiling (lane-aligned, >=128; default 512 per v6e/v7x guidance) ----
    if tile_t is None:
        tile_t = min(512, pl.cdiv(T, 128) * 128)
    tile_t = max(128, (tile_t // 128) * 128)
    n_t = pl.cdiv(T, tile_t)
    t_pad = n_t * tile_t
    win = tile_t + 2 * HALO

    # Zero-pad time: HALO columns each side + round T up to the tile grid.
    x_p = jnp.pad(x_bct, ((0, 0), (0, 0), (HALO, t_pad - T + HALO)))
    # Overlapping per-tile windows for halo recompute: (B, n_t, C_in, win).
    x_win = jnp.stack(
        [x_p[:, :, t * tile_t: t * tile_t + win] for t in range(n_t)], axis=1)

    # ---- weights: bf16 MXU operands; fuse taps when the contraction is thin --
    def prep_w(w_pt):
        cin = w_pt.shape[1]
        if cin <= fuse_taps_max_cin:
            wk = jnp.transpose(w_pt, (0, 2, 1)).reshape(w_pt.shape[0], K * cin)
        else:
            wk = jnp.transpose(w_pt, (2, 0, 1))           # (K, C_out, C_in)
        return wk.astype(compute_dtype)

    w1k, w2k, w3k = prep_w(w1), prep_w(w2), prep_w(w3)
    b1k = b1.astype(jnp.float32)[:, None]
    b2k = b2.astype(jnp.float32)[:, None]
    b3k = b3.astype(jnp.float32)[:, None]

    def const_spec(arr):
        nd = arr.ndim
        return pl.BlockSpec(arr.shape, lambda b, t, _nd=nd: (0,) * _nd)

    # ---- VMEM budget: tile footprint * headroom, clamped to [32, 64] MiB ----
    weight_bytes = sum(int(a.size) * a.dtype.itemsize
                       for a in (w1k, w2k, w3k, b1k, b2k, b3k))
    act_bytes = 4 * win * (6 * C_in + 8 * D + 2 * O)      # rough live set (f32-eq)
    vmem_limit = int(min(64 * 1024 * 1024,
                         max(32 * 1024 * 1024, 2 * (act_bytes + 2 * weight_bytes))))

    kernel = functools.partial(_reg_head_kernel, seq_len=T, tile_t=tile_t,
                               compute_dtype=compute_dtype)

    out = pl.pallas_call(
        kernel,
        out_shape=jax.ShapeDtypeStruct((B, O, t_pad), jnp.float32),
        grid_spec=pltpu.PrefetchScalarGridSpec(
            num_scalar_prefetch=0,
            grid=(B, n_t),
            in_specs=[
                pl.BlockSpec((1, 1, C_in, win), lambda b, t: (b, t, 0, 0)),
                const_spec(w1k), const_spec(b1k),
                const_spec(w2k), const_spec(b2k),
                const_spec(w3k), const_spec(b3k),
            ],
            out_specs=pl.BlockSpec((1, O, tile_t), lambda b, t: (b, 0, t)),
        ),
        compiler_params=pltpu.CompilerParams(
            dimension_semantics=("parallel", "parallel"),
            vmem_limit_bytes=vmem_limit),
    )(x_win, w1k, b1k, w2k, b2k, w3k, b3k)

    return out[:, :, :T]


def reference_forward(x_bct, params):
    """Pure-JAX f32 reference matching PyTorch Conv1d (NCW, padding=1)."""
    def conv(x, w, b):
        y = jax.lax.conv_general_dilated(
            x, w, window_strides=(1,), padding=((1, 1),),
            dimension_numbers=("NCH", "OIH", "NCH"))
        return y + b[None, :, None]

    (w1, b1), (w2, b2), (w3, b3) = params
    h = jnp.maximum(conv(x_bct, w1, b1), 0.0)
    h = jnp.maximum(conv(h, w2, b2), 0.0)
    return conv(h, w3, b3)


if __name__ == "__main__":
    # Small config: input_dim=16, feat_dim=32, output_dim=2, num_layers=3,
    # kernel_size=3, with_ln=False.  T=200 with tile_t=128 exercises the
    # multi-tile path: halo recompute at the seam, edge masks, and the
    # trailing-pad slice-off.
    B, C_in, D, O, T = 2, 16, 32, 2, 200

    key = jax.random.PRNGKey(0)
    ks = jax.random.split(key, 7)
    # PyTorch-layout params: Conv1d weight (C_out, C_in, K), bias (C_out,)
    w1 = 0.1 * jax.random.normal(ks[0], (D, C_in, K), jnp.float32)
    b1 = 0.1 * jax.random.normal(ks[1], (D,), jnp.float32)
    w2 = 0.1 * jax.random.normal(ks[2], (D, D, K), jnp.float32)
    b2 = 0.1 * jax.random.normal(ks[3], (D,), jnp.float32)
    w3 = 0.1 * jax.random.normal(ks[4], (O, D, K), jnp.float32)
    b3 = 0.1 * jax.random.normal(ks[5], (O,), jnp.float32)
    x = jax.random.normal(ks[6], (B, C_in, T), jnp.float32)
    params = ((w1, b1), (w2, b2), (w3, b3))

    ref = jax.block_until_ready(reference_forward(x, params))

    # Fused-tap path (small channels -> one deep-contraction matmul per layer).
    out_fused = jax.block_until_ready(
        pt_transformer_reg_head(x, params, tile_t=128))
    assert out_fused.shape == (B, O, T), out_fused.shape
    assert jnp.allclose(out_fused, ref, atol=6e-2, rtol=6e-2), (
        float(jnp.max(jnp.abs(out_fused - ref))))

    # Per-tap path (used for wide channels in production) on the same data.
    out_taps = jax.block_until_ready(
        pt_transformer_reg_head(x, params, tile_t=128, fuse_taps_max_cin=0))
    assert out_taps.shape == (B, O, T), out_taps.shape
    assert jnp.allclose(out_taps, ref, atol=6e-2, rtol=6e-2), (
        float(jnp.max(jnp.abs(out_taps - ref))))

    print("KERNEL_OK")
</pallas_src>

<mosaic_0001>
module attributes {stable_mosaic.version = 11 : i64} {
  func.func @_reg_head_kernel(%arg0: i32, %arg1: i32, %arg2: memref<1x1x16x134xf32, #tpu.memory_space<vmem>>, %arg3: memref<32x48xbf16, #tpu.memory_space<vmem>>, %arg4: memref<32x1xf32, #tpu.memory_space<vmem>>, %arg5: memref<32x96xbf16, #tpu.memory_space<vmem>>, %arg6: memref<32x1xf32, #tpu.memory_space<vmem>>, %arg7: memref<2x96xbf16, #tpu.memory_space<vmem>>, %arg8: memref<2x1xf32, #tpu.memory_space<vmem>>, %arg9: memref<1x2x128xf32, #tpu.memory_space<vmem>>) attributes {dimension_semantics = [#tpu.dimension_semantics<parallel>, #tpu.dimension_semantics<parallel>], iteration_bounds = array<i64: 2, 2>, scalar_prefetch = 0 : i64, scratch_operands = 0 : i64, tpu.core_type = #tpu.core_type<tc>, window_params = [{transform_indices = @transform_0, window_bounds = array<i64: 1, 1, 16, 134>}, {pipeline_mode = #tpu.pipeline_mode<synchronous>, transform_indices = @transform_1, window_bounds = array<i64: 32, 48>}, {pipeline_mode = #tpu.pipeline_mode<synchronous>, transform_indices = @transform_2, window_bounds = array<i64: 32, 1>}, {pipeline_mode = #tpu.pipeline_mode<synchronous>, transform_indices = @transform_3, window_bounds = array<i64: 32, 96>}, {pipeline_mode = #tpu.pipeline_mode<synchronous>, transform_indices = @transform_4, window_bounds = array<i64: 32, 1>}, {pipeline_mode = #tpu.pipeline_mode<synchronous>, transform_indices = @transform_5, window_bounds = array<i64: 2, 96>}, {pipeline_mode = #tpu.pipeline_mode<synchronous>, transform_indices = @transform_6, window_bounds = array<i64: 2, 1>}, {transform_indices = @transform_7, window_bounds = array<i64: 1, 2, 128>}]} {
    %c128_i32 = arith.constant 128 : i32
    %0 = arith.muli %arg1, %c128_i32 : i32
    %c0 = arith.constant 0 : index
    %c0_0 = arith.constant 0 : index
    %c0_1 = arith.constant 0 : index
    %c0_2 = arith.constant 0 : index
    %1 = vector.load %arg2[%c0, %c0_0, %c0_1, %c0_2] : memref<1x1x16x134xf32, #tpu.memory_space<vmem>>, vector<1x1x16x134xf32>
    %2 = vector.shape_cast %1 : vector<1x1x16x134xf32> to vector<16x134xf32>
    %3 = arith.truncf %2 : vector<16x134xf32> to vector<16x134xbf16>
    %4 = vector.extract_strided_slice %3 {offsets = [0, 0], sizes = [16, 132], strides = [1, 1]} : vector<16x134xbf16> to vector<16x132xbf16>
    %5 = vector.extract_strided_slice %3 {offsets = [0, 1], sizes = [16, 132], strides = [1, 1]} : vector<16x134xbf16> to vector<16x132xbf16>
    %6 = vector.extract_strided_slice %3 {offsets = [0, 2], sizes = [16, 132], strides = [1, 1]} : vector<16x134xbf16> to vector<16x132xbf16>
    %7 = tpu.concatenate %4, %5, %6 in 0 : vector<16x132xbf16>, vector<16x132xbf16>, vector<16x132xbf16> -> vector<48x132xbf16>
    %c0_3 = arith.constant 0 : index
    %c0_4 = arith.constant 0 : index
    %8 = vector.load %arg3[%c0_3, %c0_4] : memref<32x48xbf16, #tpu.memory_space<vmem>>, vector<32x48xbf16>
    %cst = arith.constant dense<0.000000e+00> : vector<32x132xf32>
    %9 = tpu.matmul %8, %7, %cst {dimension_numbers = #tpu.dot_dimension_numbers<[1], [0], [0], [1], [0, 0, 1, 1], [], []>} : vector<32x48xbf16>, vector<48x132xbf16>, vector<32x132xf32> -> vector<32x132xf32>
    %c0_5 = arith.constant 0 : index
    %c0_6 = arith.constant 0 : index
    %10 = vector.load %arg4[%c0_5, %c0_6] : memref<32x1xf32, #tpu.memory_space<vmem>>, vector<32x1xf32>
    %11 = vector.broadcast %10 : vector<32x1xf32> to vector<32x132xf32>
    %12 = arith.addf %9, %11 : vector<32x132xf32>
    %cst_7 = arith.constant 0.000000e+00 : f32
    %13 = vector.broadcast %cst_7 : f32 to vector<32x132xf32>
    %14 = arith.maximumf %12, %13 : vector<32x132xf32>
    %c2_i32 = arith.constant 2 : i32
    %15 = arith.subi %0, %c2_i32 : i32
    %16 = tpu.iota {dimensions = array<i32: 1>} : vector<1x132xi32>
    %17 = vector.broadcast %15 : i32 to vector<1x132xi32>
    %18 = arith.addi %17, %16 : vector<1x132xi32>
    %c0_i32 = arith.constant 0 : i32
    %19 = vector.broadcast %c0_i32 : i32 to vector<1x132xi32>
    %20 = arith.cmpi sge, %18, %19 : vector<1x132xi32>
    %c200_i32 = arith.constant 200 : i32
    %21 = vector.broadcast %c200_i32 : i32 to vector<1x132xi32>
    %22 = arith.cmpi slt, %18, %21 : vector<1x132xi32>
    %23 = arith.andi %20, %22 : vector<1x132xi1>
    %cst_8 = arith.constant 0.000000e+00 : f32
    %24 = vector.shape_cast %23 : vector<1x132xi1> to vector<1x132xi1>
    %25 = vector.broadcast %24 : vector<1x132xi1> to vector<32x132xi1>
    %26 = vector.broadcast %cst_8 : f32 to vector<32x132xf32>
    %27 = arith.select %25, %14, %26 : vector<32x132xi1>, vector<32x132xf32>
    %28 = arith.truncf %27 : vector<32x132xf32> to vector<32x132xbf16>
    %29 = vector.extract_strided_slice %28 {offsets = [0, 0], sizes = [32, 130], strides = [1, 1]} : vector<32x132xbf16> to vector<32x130xbf16>
    %30 = vector.extract_strided_slice %28 {offsets = [0, 1], sizes = [32, 130], strides = [1, 1]} : vector<32x132xbf16> to vector<32x130xbf16>
    %31 = vector.extract_strided_slice %28 {offsets = [0, 2], sizes = [32, 130], strides = [1, 1]} : vector<32x132xbf16> to vector<32x130xbf16>
    %32 = tpu.concatenate %29, %30, %31 in 0 : vector<32x130xbf16>, vector<32x130xbf16>, vector<32x130xbf16> -> vector<96x130xbf16>
    %c0_9 = arith.constant 0 : index
    %c0_10 = arith.constant 0 : index
    %33 = vector.load %arg5[%c0_9, %c0_10] : memref<32x96xbf16, #tpu.memory_space<vmem>>, vector<32x96xbf16>
    %cst_11 = arith.constant dense<0.000000e+00> : vector<32x130xf32>
    %34 = tpu.matmul %33, %32, %cst_11 {dimension_numbers = #tpu.dot_dimension_numbers<[1], [0], [0], [1], [0, 0, 1, 1], [], []>} : vector<32x96xbf16>, vector<96x130xbf16>, vector<32x130xf32> -> vector<32x130xf32>
    %c0_12 = arith.constant 0 : index
    %c0_13 = arith.constant 0 : index
    %35 = vector.load %arg6[%c0_12, %c0_13] : memref<32x1xf32, #tpu.memory_space<vmem>>, vector<32x1xf32>
    %36 = vector.broadcast %35 : vector<32x1xf32> to vector<32x130xf32>
    %37 = arith.addf %34, %36 : vector<32x130xf32>
    %cst_14 = arith.constant 0.000000e+00 : f32
    %38 = vector.broadcast %cst_14 : f32 to vector<32x130xf32>
    %39 = arith.maximumf %37, %38 : vector<32x130xf32>
    %c1_i32 = arith.constant 1 : i32
    %40 = arith.subi %0, %c1_i32 : i32
    %41 = tpu.iota {dimensions = array<i32: 1>} : vector<1x130xi32>
    %42 = vector.broadcast %40 : i32 to vector<1x130xi32>
    %43 = arith.addi %42, %41 : vector<1x130xi32>
    %c0_i32_15 = arith.constant 0 : i32
    %44 = vector.broadcast %c0_i32_15 : i32 to vector<1x130xi32>
    %45 = arith.cmpi sge, %43, %44 : vector<1x130xi32>
    %c200_i32_16 = arith.constant 200 : i32
    %46 = vector.broadcast %c200_i32_16 : i32 to vector<1x130xi32>
    %47 = arith.cmpi slt, %43, %46 : vector<1x130xi32>
    %48 = arith.andi %45, %47 : vector<1x130xi1>
    %cst_17 = arith.constant 0.000000e+00 : f32
    %49 = vector.shape_cast %48 : vector<1x130xi1> to vector<1x130xi1>
    %50 = vector.broadcast %49 : vector<1x130xi1> to vector<32x130xi1>
    %51 = vector.broadcast %cst_17 : f32 to vector<32x130xf32>
    %52 = arith.select %50, %39, %51 : vector<32x130xi1>, vector<32x130xf32>
    %53 = arith.truncf %52 : vector<32x130xf32> to vector<32x130xbf16>
    %54 = vector.extract_strided_slice %53 {offsets = [0, 0], sizes = [32, 128], strides = [1, 1]} : vector<32x130xbf16> to vector<32x128xbf16>
    %55 = vector.extract_strided_slice %53 {offsets = [0, 1], sizes = [32, 128], strides = [1, 1]} : vector<32x130xbf16> to vector<32x128xbf16>
    %56 = vector.extract_strided_slice %53 {offsets = [0, 2], sizes = [32, 128], strides = [1, 1]} : vector<32x130xbf16> to vector<32x128xbf16>
    %57 = tpu.concatenate %54, %55, %56 in 0 : vector<32x128xbf16>, vector<32x128xbf16>, vector<32x128xbf16> -> vector<96x128xbf16>
    %c0_18 = arith.constant 0 : index
    %c0_19 = arith.constant 0 : index
    %58 = vector.load %arg7[%c0_18, %c0_19] : memref<2x96xbf16, #tpu.memory_space<vmem>>, vector<2x96xbf16>
    %cst_20 = arith.constant dense<0.000000e+00> : vector<2x128xf32>
    %59 = tpu.matmul %58, %57, %cst_20 {dimension_numbers = #tpu.dot_dimension_numbers<[1], [0], [0], [1], [0, 0, 1, 1], [], []>} : vector<2x96xbf16>, vector<96x128xbf16>, vector<2x128xf32> -> vector<2x128xf32>
    %c0_21 = arith.constant 0 : index
    %c0_22 = arith.constant 0 : index
    %60 = vector.load %arg8[%c0_21, %c0_22] : memref<2x1xf32, #tpu.memory_space<vmem>>, vector<2x1xf32>
    %61 = vector.broadcast %60 : vector<2x1xf32> to vector<2x128xf32>
    %62 = arith.addf %59, %61 : vector<2x128xf32>
    %c0_23 = arith.constant 0 : index
    %c0_24 = arith.constant 0 : index
    %c0_25 = arith.constant 0 : index
    %63 = vector.load %arg9[%c0_23, %c0_24, %c0_25] : memref<1x2x128xf32, #tpu.memory_space<vmem>>, vector<1x2x128xf32>
    %64 = vector.shape_cast %63 : vector<1x2x128xf32> to vector<2x128xf32>
    %65 = vector.shape_cast %62 : vector<2x128xf32> to vector<1x2x128xf32>
    tpu.vector_store %arg9[%c0_23, %c0_24, %c0_25], %65 {strides = array<i32>} : memref<1x2x128xf32, #tpu.memory_space<vmem>>, vector<1x2x128xf32>,
    return
  }
  func.func @transform_0(%arg0: i32, %arg1: i32) -> (i32, i32, i32, i32) {
    %c0_i32 = arith.constant 0 : i32
    %c0_i32_0 = arith.constant 0 : i32
    %c0_i32_1 = arith.constant 0 : i32
    return %arg0, %arg1, %c0_i32, %c0_i32_0 : i32, i32, i32, i32
  }
  func.func @transform_1(%arg0: i32, %arg1: i32) -> (i32, i32) {
    %c0_i32 = arith.constant 0 : i32
    %c0_i32_0 = arith.constant 0 : i32
    %c0_i32_1 = arith.constant 0 : i32
    return %c0_i32, %c0_i32_0 : i32, i32
  }
  func.func @transform_2(%arg0: i32, %arg1: i32) -> (i32, i32) {
    %c0_i32 = arith.constant 0 : i32
    %c0_i32_0 = arith.constant 0 : i32
    %c0_i32_1 = arith.constant 0 : i32
    return %c0_i32, %c0_i32_0 : i32, i32
  }
  func.func @transform_3(%arg0: i32, %arg1: i32) -> (i32, i32) {
    %c0_i32 = arith.constant 0 : i32
    %c0_i32_0 = arith.constant 0 : i32
    %c0_i32_1 = arith.constant 0 : i32
    return %c0_i32, %c0_i32_0 : i32, i32
  }
  func.func @transform_4(%arg0: i32, %arg1: i32) -> (i32, i32) {
    %c0_i32 = arith.constant 0 : i32
    %c0_i32_0 = arith.constant 0 : i32
    %c0_i32_1 = arith.constant 0 : i32
    return %c0_i32, %c0_i32_0 : i32, i32
  }
  func.func @transform_5(%arg0: i32, %arg1: i32) -> (i32, i32) {
    %c0_i32 = arith.constant 0 : i32
    %c0_i32_0 = arith.constant 0 : i32
    %c0_i32_1 = arith.constant 0 : i32
    return %c0_i32, %c0_i32_0 : i32, i32
  }
  func.func @transform_6(%arg0: i32, %arg1: i32) -> (i32, i32) {
    %c0_i32 = arith.constant 0 : i32
    %c0_i32_0 = arith.constant 0 : i32
    %c0_i32_1 = arith.constant 0 : i32
    return %c0_i32, %c0_i32_0 : i32, i32
  }
  func.func @transform_7(%arg0: i32, %arg1: i32) -> (i32, i32, i32) {
    %c0_i32 = arith.constant 0 : i32
    %c0_i32_0 = arith.constant 0 : i32
    return %arg0, %c0_i32, %arg1 : i32, i32, i32
  }
}

</mosaic_0001>

<bundles_post_ra>
// kernel: tpu_custom_call.1
= control target key start
LH: loop header
LB: loop body
LE: loop exit
PB: predicated region body
PF: predicated region fallthrough
CT: control target
= control target key end

     0   :  { %s1477_s0 = inlined_call_operand.hbm [shape: f32[2,2,16,134], index: 0, kind: input, shape index: {}]   ;;  %s1478_s1 = inlined_call_operand.vmem [shape: bf16[32,48], index: 1, kind: input, shape index: {}]   ;;  %s1479_s2 = inlined_call_operand.vmem [shape: f32[32,1], index: 2, kind: input, shape index: {}]   ;;  %s1480_s3 = inlined_call_operand.vmem [shape: bf16[32,96], index: 3, kind: input, shape index: {}]   ;;  %s1481_s4 = inlined_call_operand.vmem [shape: f32[32,1], index: 4, kind: input, shape index: {}]   ;;  %s1482_s5 = inlined_call_operand.vmem [shape: bf16[2,96], index: 5, kind: input, shape index: {}]   ;;  %s1483_s6 = inlined_call_operand.vmem [shape: f32[2,1], index: 6, kind: input, shape index: {}]   ;;  %s1484_s7 = inlined_call_operand.hbm [shape: f32[2,2,256], index: 7, kind: output, shape index: {}]  }
   0x1   :  { %1490 = sst [smem:[#allocation12_spill]] %s1482_s5 }
   0x2   :  { %1491 = sst [smem:[#allocation13_spill]] %s1484_s7 }
   0x3   :  { %12 = vsyncpa [#allocation3], 0 }
   0x4   :  { %14 = vsyncpa [#allocation3 + $0x1], 0 }
   0x5   :  { %15 = vsyncpa [#allocation4], 0 }
   0x6   :  { %17 = vsyncpa [#allocation4 + $0x1], 0  ;;  %s1156_s24 = smov 0   ;;  %s1158_s25 = smov 0  }
   0x7   :  { %s1160_s26 = smov 0   ;;  %s1162_s27 = smov 0  }
   0x8   :  { %s1164_s28 = smov 0   ;;  %s1166_s29 = smov 0  }
   0x9   :  { %s1168_s30 = smov 0   ;;  %s1170_s8 = smov 0  }
   0xa LB: > { %1492 = sst [smem:[#allocation8_spill]] %s1077_s24  ;;  %s821_s9 = sadd.s32 4294967295, %s1105_s8   ;;  %s1105_s8 = sphi %s1170_s8, %s23_s8   ;;  %s1101_s30 = sphi %s1168_s30, %s1517_s30   ;;  %s1097_s29 = sphi %s1166_s29, %s1511_s29   ;;  %s1093_s28 = sphi %s1164_s28, %s1516_s28   ;;  %s1089_s27 = sphi %s1162_s27, %s1510_s27   ;;  %s1085_s26 = sphi %s1160_s26, %s1515_s26   ;;  %s1081_s25 = sphi %s1158_s25, %s1514_s25   ;;  %s1077_s24 = sphi %s1156_s24, %s1513_s24  }
   0xb   : > { %1493 = sst [smem:[#allocation9_spill]] %s1097_s29  ;;  %s822_s10 = sadd.s32 4294967294, %s1105_s8  }
   0xc   : > { %s32_s11 = sadd.s32 1, %s1097_s29  ;;  %s35_s12 = sadd.s32 1, %s1101_s30 }
   0xd   : > { %p33_p0 = scmp.ge.s32.totalorder %s32_s11, 2  ;;  %s44_s13 = sadd.s32 1, %s1085_s26 }
   0xe   : > { %p51_p1 = scmp.ne.s32.totalorder %s1085_s26, %s1081_s25  ;;  %p52_p2 = scmp.eq.s32.totalorder %s1105_s8, 0 }
   0xf   : > { %s1519_s11 = smov (%p33_p0, %s32_s11), 0  ;;  %s1521_s12 = smov (!%p33_p0, %s35_s12), %s1101_s30 }
  0x10   : > { %1494 = sst [smem:[#allocation10_spill]] %s1519_s11  ;;  %s40_s14 = ssub.s32 %s1097_s29, %s1519_s11 }
  0x11   : > { %p1209_p3 = por %p52_p2, %p51_p1  ;;  %p37_p4 = scmp.ge.s32.totalorder %s1521_s12, 2 }
  0x12   : > { %p57_p5 = scmp.ne.s32.totalorder %s1081_s25, %s1077_s24  ;;  %p58_p6 = scmp.eq.s32.totalorder %s821_s9, 0 }
  0x13   : > { %p209_p7 = scmp.eq.s32.totalorder %s821_s9, 3  ;;  %s1523_s12 = smov (%p37_p4, %s1521_s12), 0 }
  0x14   : > { %1496 = sst [smem:[#allocation11_spill]] %s1523_s12  ;;  %p1217_p8 = por %p58_p6, %p57_p5 }
  0x15   : > { %p1221_p9 = por %p209_p7, %p51_p1  ;;  %s39_s18 = ssub.s32 %s1101_s30, %s1523_s12 }
  0x16   : > { %p215_p10 = scmp.eq.s32.totalorder %s822_s10, 3  ;;  %s41_s19 = sor.u32 %s40_s14, %s39_s18 }
  0x17   : > { %p42_p11 = scmp.eq.s32.totalorder %s41_s19, 0  ;;  %p902_p13 = scmp.lt.s32.totalorder %s1105_s8, 4 }
  0x18   : > { %p1227_p12 = por %p215_p10, %p57_p5  ;;  %s253_s21 = sand.u32 1, %s1085_s26  }
  0x19   : > { %s1234_s22 = scalar_select %p42_p11, %s1085_s26, %s44_s13  }
  0x1a   : > { %s825_s23 = sshll.u32 %s253_s21, 5  ;;  %s826_s9 = sshll.u32 %s1097_s29, 2 }
  0x1b   : > { %s827_s11 = sshll.u32 %s1101_s30, 3  ;;  %s257_s24 = scalar_lea.vmem [#allocation2], %s825_s23 }
  0x1c   : > { %s266_s7 = sshll.u32 %s257_s24, 4  ;;  %s263_s5 = sadd.s32 %s827_s11, %s826_s9  ;;  %s267_s7 = int_to_ptr.vmem [resolvable:$true] %s266_s7 }
  0x1d   : > { %s828_s12 = sshll.u32 %s263_s5, 7  ;;  %p1240_p0 = pnand %p902_p13, %p1209_p3 }
  0x1e   : > { %s265_s19 = scalar_lea.hbm %s1477_s0, %s828_s12  ;;  %s254_s13 = scalar_lea.sflag [#allocation3], %s253_s21 }
  0x1f   : > { %p983_p1 = pneg %p1240_p0  ;;  %s994_s29 = scalar_lea.vmem %s267_s7, 512 }
  0x20   : > { %p995_p2 = scmp.ne.s32.totalorder %s267_s7, %s994_s29  ;;  %s1107_s24 = smov [#allocation2]  }
  0x21   : > { %s999_s11 = sshll.u32 %s1107_s24, 4  ;;  %s1000_s11 = int_to_ptr.vmem [resolvable:$false] %s999_s11 }
  0x22   : > { %p997_p4 = pnand %p995_p2, %p983_p1  ;;  %s1001_s5 = scalar_lea.vmem %s1000_s11, 1024 }
  0x23   : > { %p1002_p3 = scmp.lt.s32.totalorder %s267_s7, %s1000_s11  ;;  %p1003_p6 = scmp.lt.s32.totalorder %s1001_s5, %s994_s29 }
  0x24   : > { %p998_p5 = pneg %p997_p4 }
  0x25   : > { %p1004_p7 = por %p1003_p6, %p1002_p3 }
  0x27   : > { %p1005_p10 = pnand %p1004_p7, %p998_p5 }
  0x29   : > { %1008 = shalt.err (!%p1005_p10)
}
  0x2a   : > { %s1108_s15 = smov 256   ;;  %s1109_s12 = smov 16  }
  0x2b   : > { %897 = dma.hbm_to_vmem [thread:$0]  (!%p1240_p0), %s265_s19, 512, %s267_s7, %s254_s13, %s1108_s15, %s1108_s15, %s1109_s12  }
  0x2c   : > { %p829_p11 = scmp.ge.s32.totalorder %s1105_s8, 1  ;;  %p274_p13 = scmp.lt.s32.totalorder %s1105_s8, 5 }
  0x2e   : > { %p275_p1 = pnand %p829_p11, %p274_p13 }
  0x2f   : > { %s1254_s21 = sand.u32 (!%p275_p1), 1, %s1081_s25  }
  0x30   : > { %278 = sbr.rel (%p275_p1) target bundleno = 1103 (0x44f), region = 48  ;;  %s830_s29 = sshll.u32 (!%p275_p1), %s1254_s21, 5 }
  0x31   : > { %s281_s23 = scalar_lea.sflag (!%p275_p1), [#allocation3], %s1254_s21  ;;  %s284_s9 = scalar_lea.vmem (!%p275_p1), [#allocation2], %s830_s29 }
  0x35   : > { %1068 = dma.done.wait (%p1217_p8), %s281_s23, 512  }
  0x36   : > { %1070 = vsyncadd (%p1217_p8), %s281_s23, 4294966784  ;;  %v317_v0 = vld [vmem:[%s284_s9] sm:$0xff]  ;;  %v319_v1 = vld [vmem:[%s284_s9 + $0x10] sm:$0xff]  ;;  %s1110_s7 = smov 127   ;;  %s1111_s10 = smov 126   ;;  %v1112_v6 = vmov 0   ;;  %v448_v21 = vlaneseq }
  0x37   : > { %v318_v2 = vld [vmem:[%s284_s9 + $0x8] sm:$0xff]  ;;  %v321_v3 = vpack.c.bf16 %v319_v1, %v317_v0  ;;  %v320_v4 = vld [vmem:[%s284_s9 + $0x18] sm:$0xff]  ;;  %418 = vmatprep.mubr.bf16.mxu0 %v1112_v6  ;;  %976 = vset.pattern.permute.xlu1 %v1112_v6  ;;  %v347_v8 = vld [vmem:[%s1479_s2 + $0x10] sm:$0xff]  ;;  %vm337_vm0 = vcmask 1031168   ;;  %vm329_vm1 = vcmask 1039360   ;;  %vm379_vm2 = vcmask 392192  }
  0x38   : > { %v322_v5 = vpack.c.bf16 %v320_v4, %v318_v2  ;;  %975 = vset.pattern.permute.xlu0 %v1112_v6  ;;  %585 = vmatprep.mubr.bf16.mxu1 %v1112_v6  ;;  %v348_v7 = vld [vmem:[%s1479_s2 + $0x18] sm:$0xff]  ;;  %v345_v9 = vld [vmem:[%s1479_s2] sm:$0xff]  ;;  %v346_v10 = vld [vmem:[%s1479_s2 + $0x8] sm:$0xff]  ;;  %s832_s9 = sshll.u32 %s1089_s27, 7  ;;  %v1294_v24 = vand.u32 127, %v448_v21  ;;  %vm546_vm11 = vcmask 785408  }
  0x39   : > { %325 = vrot.lane.b32.xlu1 %v321_v3, %s1110_s7  ;;  %333 = vrot.lane.b32.xlu0 %v321_v3, %s1111_s10  ;;  %v977_v17 = vld [vmem:[%s1478_s1] sm:$0xff]   ;;  %v978_v18 = vld [vmem:[%s1478_s1 + $0x8] sm:$0xff]   ;;  %s837_s16 = sadd.s32 4294967294, %s832_s9  ;;  %s854_s14 = sadd.s32 4294967295, %s832_s9 }
  0x3a   : > { %v451_v29 = vstv %s837_s16  ;;  %v1297_v32 = vadd.s32 128, %v1294_v24  ;;  %s1507_s19 = sld [smem:[#allocation12_spill]]  ;;  %s831_s13 = sshll.u32 %s1254_s21, 1 }
  0x3b   : > { %v452_v37 = vadd.s32 %v451_v29, %v1294_v24  ;;  %s863_s24 = sshll.u32 %s1093_s28, 1  ;;  %s314_s15 = scalar_lea.vmem [#allocation5], %s831_s13 }
  0x3c   : > { %v453_v43 = vadd.s32 %v451_v29, %v1297_v32  ;;  %s731_s11 = sadd.s32 %s1089_s27, %s863_s24  ;;  %s735_s12 = sshll.u32 %s314_s15, 4  ;;  %s1426_s12 = int_to_ptr.vmem [resolvable:$true] %s735_s12 }
  0x3d   : > { %327 = vrot.lane.b32.xlu1 %v322_v5, %s1110_s7  ;;  %335 = vrot.lane.b32.xlu0 %v322_v5, %s1111_s10  ;;  %vm454_vm3 = vcmp.ge.s32.totalorder %v452_v37, 0  ;;  %vm456_vm4 = vcmp.lt.s32.totalorder %v452_v37, 200  ;;  %v615_v37 = vstv %s854_s14  ;;  %s864_s5 = sshll.u32 %s731_s11, 5  ;;  %s1508_s16 = sld [smem:[#allocation13_spill]] }
  0x3e   : > { %vm455_vm5 = vcmp.ge.s32.totalorder %v453_v43, 0  ;;  %vm457_vm6 = vcmp.lt.s32.totalorder %v453_v43, 200  ;;  %vm1305_vm7 = vmand %vm454_vm3, %vm456_vm4  ;;  %vm1114_vm4 = vmmov 0   ;;  %s720_s27 = scalar_lea.sflag [#allocation4], %s1254_s21  ;;  %s1009_s28 = scalar_lea.vmem %s1426_s12, 32 }
  0x3f   : > { %vm1313_vm8 = vmand %vm455_vm5, %vm457_vm6  ;;  %p1010_p8 = scmp.ne.s32.totalorder %s1426_s12, %s1009_s28  ;;  %s1115_s9 = smov [#allocation5]  }
  0x40   : > { %vm840_vm9 = vmpackc.low %vm1313_vm8, %vm1313_vm8  ;;  %s1013_s18 = sshll.u32 %s1115_s9, 4  ;;  %s1014_s18 = int_to_ptr.vmem [resolvable:$false] %s1013_s18 }
  0x41   : > { %366 = vperm.xlu1 %976, %v348_v7   ;;  %361 = vperm.xlu0 %975, %v347_v8   ;;  %v514_v8 = vld [vmem:[%s1481_s4 + $0x10] sm:$0xff]  ;;  %vm843_vm10 = vmpackc.low %vm1305_vm7, %vm1305_vm7  ;;  %p1011_p0 = pnand %p1010_p8, %p1221_p9  ;;  %p1016_p4 = scmp.lt.s32.totalorder %s1426_s12, %s1014_s18 }
  0x43   : > { %s1424_s14 = scalar_lea.hbm %s1508_s16, %s864_s5  ;;  %p1012_p2 = pneg %p1011_p0 }
  0x45   : > { %351 = vperm.xlu1 %976, %v345_v9   ;;  %356 = vperm.xlu0 %975, %v346_v10   ;;  %v515_v9 = vld [vmem:[%s1481_s4 + $0x18] sm:$0xff]  ;;  %v512_v10 = vld [vmem:[%s1481_s4] sm:$0xff] }
  0xab   : > { %v326_v11 = vpop.permute.xlu1 %325  ;;  %v334_v12 = vpop.permute.xlu0 %333 }
  0xaf   : > { %v336_v13 = vpop.permute.xlu0 %335  ;;  %v328_v15 = vpop.permute.xlu1 %327 }
  0xb0   : > { %396 = vmatprep.subr.bf16.mxu0 %v336_v13  ;;  %v338_v14 = vsel %vm337_vm0, %v334_v12, %v336_v13  ;;  %v330_v16 = vsel %vm329_vm1, %v326_v11, %v328_v15  ;;  %v513_v11 = vld [vmem:[%s1481_s4 + $0x8] sm:$0xff] }
  0xb1   : > { %397 = vmatpush1.bf16.msra.mxu0 %v338_v14 }
  0xb2   : > { %398 = vmatprep.subr.bf16.mxu0 %v328_v15 }
  0xb5   : > { %399 = vmatpush1.bf16.msra.mxu0 %v330_v16 }
  0xb6   : > { %400 = vmatprep.subr.bf16.mxu0 %v322_v5 }
  0xb9   : > { %401 = vmatpush1.bf16.msra.mxu0 %v321_v3 }
  0xbc   : > { %835 = vmatmul.mubr.msk.bf16.vlgmr.msra.gmra.mxu0 %vm379_vm2, %v977_v17  ;;  %v367_v19 = vpop.permute.xlu1 %366  ;;  %v362_v20 = vpop.permute.xlu0 %361 }
  0xbd   : > { %428 = vmatprep.mubr.bf16.mxu0 %v1112_v6 }
  0xc0   : > { %v352_v22 = vpop.permute.xlu1 %351  ;;  %v357_v26 = vpop.permute.xlu0 %356 }
  0xc4   : > { %836 = vmatmul.mubr.msk.bf16.gmra.mxu0 %vm379_vm2, %v978_v18 }
 0x17c   : > { %v420_v23 = vpop.f32.mrf.mxu0 }
 0x17d   : > { %v421_v27 = vadd.f32 %v420_v23, %v352_v22 }
 0x17e   : > { %v422_v25 = vpop.f32.mrf.mxu0 }
 0x17f   : > { %v423_v30 = vadd.f32 %v422_v25, %v352_v22  ;;  %v439_v34 = vmax.f32 %v421_v27, 0.0  ;;  %v979_v25 = vld [vmem:[%s1480_s3] sm:$0xff]  }
 0x180   : > { %v424_v28 = vpop.f32.mrf.mxu0 }
 0x181   : > { %v425_v31 = vadd.f32 %v424_v28, %v357_v26  ;;  %v440_v39 = vmax.f32 %v423_v30, 0.0  ;;  %v464_v2 = vsel %vm1305_vm7, %v439_v34, 0.0 }
 0x182   : > { %v426_v33 = vpop.f32.mrf.mxu0 }
 0x183   : > { %v441_v35 = vmax.f32 %v425_v31, 0.0  ;;  %v427_v36 = vadd.f32 %v426_v33, %v357_v26  ;;  %v465_v5 = vsel %vm1313_vm8, %v440_v39, 0.0  ;;  %v980_v26 = vld [vmem:[%s1480_s3 + $0x8] sm:$0xff]  }
 0x184   : > { %v430_v38 = vpop.f32.mrf.mxu0 }
 0x185   : > { %v1300_v40 = vpack.c.bf16 %v441_v35, %v439_v34  ;;  %v442_v41 = vmax.f32 %v427_v36, 0.0  ;;  %v431_v42 = vadd.f32 %v430_v38, %v362_v20  ;;  %v466_v61 = vsel %vm1305_vm7, %v441_v35, 0.0 }
 0x186   : > { %v432_v44 = vpop.f32.mrf.mxu0  ;;  %v472_v4 = vpack.c.bf16 %v466_v61, %v464_v2 }
 0x187   : > { %v1303_v45 = vpack.c.bf16 %v442_v41, %v440_v39  ;;  %v433_v46 = vadd.f32 %v432_v44, %v362_v20  ;;  %v443_v48 = vmax.f32 %v431_v42, 0.0  ;;  %v467_v3 = vsel %vm1313_vm8, %v442_v41, 0.0 }
 0x188   : > { %v434_v47 = vpop.f32.mrf.mxu0  ;;  %v473_v7 = vpack.c.bf16 %v467_v3, %v465_v5  ;;  %v616_v41 = vadd.s32 %v615_v37, %v1294_v24  ;;  %v1113_v44 = vmov 0.0  }
 0x189   : > { %v435_v49 = vadd.f32 %v434_v47, %v367_v19  ;;  %v444_v51 = vmax.f32 %v433_v46, 0.0  ;;  %v468_v55 = vsel %vm1305_vm7, %v443_v48, 0.0  ;;  %874 = vmatprep.subr.bf16.mxu0 %v1113_v44  ;;  %886 = vmatprep.mubr.msk.bf16.mxu0 %vm1114_vm4, %v1113_v44 }
 0x18a   : > { %v436_v50 = vpop.f32.mrf.mxu0  ;;  %vm618_vm12 = vcmp.ge.s32.totalorder %v616_v41, 0  ;;  %vm620_vm13 = vcmp.lt.s32.totalorder %v616_v41, 200 }
 0x18b   : > { %v445_v52 = vmax.f32 %v435_v49, 0.0  ;;  %v437_v53 = vadd.f32 %v436_v50, %v367_v19  ;;  %v469_v62 = vsel %vm1313_vm8, %v444_v51, 0.0  ;;  %vm1377_vm2 = vmand %vm618_vm12, %vm620_vm13 }
 0x18d   : > { %v470_v56 = vsel %vm1305_vm7, %v445_v52, 0.0  ;;  %v844_v57 = vpack.c.bf16 %v445_v52, %v443_v48  ;;  %v446_v58 = vmax.f32 %v437_v53, 0.0 }
 0x18e   : > { %v474_v60 = vpack.c.bf16 %v470_v56, %v468_v55 }
 0x18f   : > { %v471_v63 = vsel %vm1313_vm8, %v446_v58, 0.0  ;;  %v841_v0 = vpack.c.bf16 %v446_v58, %v444_v51 }
 0x190   : > { %498 = vrot.lane.b32.xlu1 %v474_v60, %s1111_s10  ;;  %v475_v1 = vpack.c.bf16 %v471_v63, %v469_v62 }
 0x192   : > { %500 = vrot.lane.b32.xlu0 %v475_v1, %s1111_s10 }
 0x194   : > { %494 = vrot.lane.b32.xlu1 %v472_v4, %s1111_s10 }
 0x196   : > { %496 = vrot.lane.b32.xlu0 %v473_v7, %s1111_s10 }
 0x198   : > { %484 = vrot.lane.b32.xlu1 %v474_v60, %s1110_s7 }
 0x19a   : > { %486 = vrot.lane.b32.xlu0 %v475_v1, %s1110_s7 }
 0x19c   : > { %480 = vrot.lane.b32.xlu1 %v472_v4, %s1110_s7 }
 0x19e   : > { %482 = vrot.lane.b32.xlu0 %v473_v7, %s1110_s7 }
 0x1a0   : > { %528 = vperm.xlu1 %976, %v514_v8  }
 0x1a2   : > { %533 = vperm.xlu0 %975, %v515_v9   ;;  %v669_v9 = vld [vmem:[%s1483_s6] sm:$0x3] }
 0x1a4   : > { %518 = vperm.xlu1 %976, %v512_v10  }
 0x1a6   : > { %523 = vperm.xlu0 %975, %v513_v11  }
 0x202   : > { %v499_v12 = vpop.permute.xlu1 %498 }
 0x204   : > { %v501_v13 = vpop.permute.xlu0 %500 }
 0x205   : > { %557 = vmatprep.subr.bf16.mxu1 %v501_v13  ;;  %v503_v14 = vsel %vm337_vm0, %v499_v12, %v501_v13 }
 0x206   : > { %v495_v15 = vpop.permute.xlu1 %494  ;;  %558 = vmatpush1.bf16.msra.mxu1 %v503_v14 }
 0x208   : > { %v497_v16 = vpop.permute.xlu0 %496 }
 0x209   : > { %559 = vmatprep.subr.bf16.mxu1 %v497_v16  ;;  %v502_v17 = vsel %vm337_vm0, %v495_v15, %v497_v16 }
 0x20a   : > { %v485_v18 = vpop.permute.xlu1 %484  ;;  %560 = vmatpush1.bf16.msra.mxu1 %v502_v17 }
 0x20c   : > { %v487_v19 = vpop.permute.xlu0 %486 }
 0x20d   : > { %561 = vmatprep.subr.bf16.mxu1 %v487_v19  ;;  %v489_v20 = vsel %vm329_vm1, %v485_v18, %v487_v19 }
 0x20e   : > { %562 = vmatpush1.bf16.msra.mxu1 %v489_v20  ;;  %v481_v21 = vpop.permute.xlu1 %480 }
 0x210   : > { %v483_v22 = vpop.permute.xlu0 %482 }
 0x211   : > { %563 = vmatprep.subr.bf16.mxu1 %v483_v22  ;;  %v488_v23 = vsel %vm329_vm1, %v481_v21, %v483_v22  ;;  %v668_v22 = vld [vmem:[%s1507_s19] sm:$0x1] }
 0x212   : > { %564 = vmatpush1.bf16.msra.mxu1 %v488_v23 }
 0x213   : > { %842 = vmatprep.subr.msk.bf16.mxu1 %vm840_vm9, %v841_v0 }
 0x216   : > { %845 = vmatpush1.bf16.msk.msra.mxu1 %vm843_vm10, %v844_v57 }
 0x217   : > { %848 = vmatprep.subr.msk.bf16.mxu1 %vm840_vm9, %v1303_v45  ;;  %v617_v45 = vadd.s32 %v615_v37, %v1297_v32 }
 0x219   : > { %vm619_vm14 = vcmp.ge.s32.totalorder %v617_v45, 0  ;;  %vm621_vm15 = vcmp.lt.s32.totalorder %v617_v45, 200 }
 0x21a   : > { %851 = vmatpush1.bf16.msk.msra.mxu1 %vm843_vm10, %v1300_v40  ;;  %vm623_vm3 = vmand %vm619_vm14, %vm621_vm15 }
 0x21b   : > { %v529_v27 = vpop.permute.xlu1 %528 }
 0x21d   : > { %852 = vmatmul.mubr.msk.bf16.vlgmr.msra.gmra.mxu1 %vm546_vm11, %v979_v25  ;;  %v534_v28 = vpop.permute.xlu0 %533 }
 0x21e   : > { %595 = vmatprep.mubr.bf16.mxu1 %v1112_v6 }
 0x21f   : > { %v519_v30 = vpop.permute.xlu1 %518 }
 0x221   : > { %v524_v34 = vpop.permute.xlu0 %523 }
 0x225   : > { %853 = vmatmul.mubr.msk.bf16.gmra.mxu1 %vm546_vm11, %v980_v26 }
 0x2dd   : > { %v587_v29 = vpop.f32.mrf.mxu1 }
 0x2de   : > { %v588_v33 = vadd.f32 %v587_v29, %v519_v30 }
 0x2df   : > { %v589_v31 = vpop.f32.mrf.mxu1 }
 0x2e0   : > { %v606_v6 = vmax.f32 %v588_v33, 0.0  ;;  %v590_v24 = vadd.f32 %v589_v31, %v519_v30 }
 0x2e1   : > { %v591_v35 = vpop.f32.mrf.mxu1 }
 0x2e2   : > { %v592_v36 = vadd.f32 %v591_v35, %v524_v34  ;;  %v607_v62 = vmax.f32 %v590_v24, 0.0  ;;  %v628_v3 = vsel %vm1377_vm2, %v606_v6, 0.0 }
 0x2e3   : > { %v593_v38 = vpop.f32.mrf.mxu1 }
 0x2e4   : > { %v608_v39 = vmax.f32 %v592_v36, 0.0  ;;  %v594_v48 = vadd.f32 %v593_v38, %v524_v34  ;;  %v629_v7 = vsel %vm623_vm3, %v607_v62, 0.0 }
 0x2e5   : > { %v597_v40 = vpop.f32.mrf.mxu1 }
 0x2e6   : > { %v1373_v42 = vpack.c.bf16 %v608_v39, %v606_v6  ;;  %v598_v43 = vadd.f32 %v597_v40, %v529_v27  ;;  %v609_v32 = vmax.f32 %v594_v48, 0.0  ;;  %v630_v63 = vsel %vm1377_vm2, %v608_v39, 0.0 }
 0x2e7   : > { %v599_v46 = vpop.f32.mrf.mxu1  ;;  %v636_v5 = vpack.c.bf16 %v630_v63, %v628_v3 }
 0x2e8   : > { %v600_v47 = vadd.f32 %v599_v46, %v529_v27  ;;  %v610_v50 = vmax.f32 %v598_v43, 0.0  ;;  %v631_v4 = vsel %vm623_vm3, %v609_v32, 0.0 }
 0x2e9   : > { %v601_v49 = vpop.f32.mrf.mxu1  ;;  %v637_v8 = vpack.c.bf16 %v631_v4, %v629_v7 }
 0x2ea   : > { %v602_v51 = vadd.f32 %v601_v49, %v534_v28  ;;  %v611_v53 = vmax.f32 %v600_v47, 0.0  ;;  %v632_v57 = vsel %vm1377_vm2, %v610_v50, 0.0 }
 0x2eb   : > { %v603_v52 = vpop.f32.mrf.mxu1 }
 0x2ec   : > { %v612_v54 = vmax.f32 %v602_v51, 0.0  ;;  %v604_v55 = vadd.f32 %v603_v52, %v534_v28  ;;  %v633_v0 = vsel %vm623_vm3, %v611_v53, 0.0 }
 0x2ee   : > { %v634_v58 = vsel %vm1377_vm2, %v612_v54, 0.0  ;;  %v856_v59 = vpack.c.bf16 %v612_v54, %v610_v50  ;;  %v613_v60 = vmax.f32 %v604_v55, 0.0 }
 0x2ef   : > { %v638_v61 = vpack.c.bf16 %v634_v58, %v632_v57 }
 0x2f0   : > { %v635_v1 = vsel %vm623_vm3, %v613_v60, 0.0 }
 0x2f1   : > { %660 = vrot.lane.b32.xlu1 %v638_v61, %s1111_s10  ;;  %v639_v2 = vpack.c.bf16 %v635_v1, %v633_v0 }
 0x2f3   : > { %662 = vrot.lane.b32.xlu0 %v639_v2, %s1111_s10 }
 0x2f5   : > { %656 = vrot.lane.b32.xlu1 %v636_v5, %s1111_s10 }
 0x2f7   : > { %658 = vrot.lane.b32.xlu0 %v637_v8, %s1111_s10 }
 0x2f9   : > { %648 = vrot.lane.b32.xlu1 %v638_v61, %s1110_s7 }
 0x2fb   : > { %650 = vrot.lane.b32.xlu0 %v639_v2, %s1110_s7 }
 0x2fd   : > { %644 = vrot.lane.b32.xlu1 %v636_v5, %s1110_s7 }
 0x2ff   : > { %646 = vrot.lane.b32.xlu0 %v637_v8, %s1110_s7  ;;  %s1015_s7 = scalar_lea.vmem %s1014_s18, 64 }
 0x300   : > { %p1017_p5 = scmp.lt.s32.totalorder %s1015_s7, %s1009_s28 }
 0x301   : > { %672 = vperm.xlu1 %976, %v669_v9  }
 0x302   : > { %p1018_p3 = por %p1017_p5, %p1016_p4 }
 0x304   : > { %p1019_p6 = pnand %p1018_p3, %p1012_p2 }
 0x363   : > { %v661_v10 = vpop.permute.xlu1 %660 }
 0x365   : > { %v663_v11 = vpop.permute.xlu0 %662 }
 0x366   : > { %v665_v12 = vsel %vm337_vm0, %v661_v10, %v663_v11 }
 0x367   : > { %v657_v13 = vpop.permute.xlu1 %656  ;;  %875 = vmatpush3.bf16.msra.mxu0 %v665_v12 }
 0x368   : > { %876 = vmatprep.subr.bf16.mxu0 %v1113_v44 }
 0x369   : > { %v659_v14 = vpop.permute.xlu0 %658 }
 0x36a   : > { %v664_v15 = vsel %vm337_vm0, %v657_v13, %v659_v14  ;;  %vm855_vm0 = vmpackc.low %vm1377_vm2, %vm1377_vm2 }
 0x36b   : > { %v649_v16 = vpop.permute.xlu1 %648  ;;  %877 = vmatpush3.bf16.msra.mxu0 %v664_v15 }
 0x36c   : > { %878 = vmatprep.subr.bf16.mxu0 %v1113_v44 }
 0x36d   : > { %v651_v17 = vpop.permute.xlu0 %650 }
 0x36e   : > { %v653_v18 = vsel %vm329_vm1, %v649_v16, %v651_v17 }
 0x36f   : > { %879 = vmatpush3.bf16.msra.mxu0 %v653_v18  ;;  %v645_v19 = vpop.permute.xlu1 %644 }
 0x370   : > { %880 = vmatprep.subr.bf16.mxu0 %v1113_v44 }
 0x371   : > { %v647_v20 = vpop.permute.xlu0 %646 }
 0x372   : > { %v652_v21 = vsel %vm329_vm1, %v645_v19, %v647_v20 }
 0x373   : > { %881 = vmatpush3.bf16.msra.mxu0 %v652_v21 }
 0x374   : > { %882 = vmatprep.subr.bf16.mxu0 %v1113_v44 }
 0x377   : > { %883 = vmatpush3.bf16.msk.msra.mxu0 %vm855_vm0, %v856_v59 }
 0x378   : > { %884 = vmatprep.subr.bf16.mxu0 %v1113_v44 }
 0x37b   : > { %885 = vmatpush3.bf16.msk.msra.mxu0 %vm855_vm0, %v1373_v42 }
 0x37c   : > { %v673_v23 = vpop.permute.xlu1 %672 }
 0x37e   : > { %887 = vmatmul.mubr.msk.bf16.vlgmr.msra.gmra.mxu0 %vm546_vm11, %v668_v22 }
 0x43e   : > { %v712_v25 = vpop.f32.mrf.mxu0 }
 0x43f   : > { %v713_v26 = vadd.f32 %v712_v25, %v673_v23 }
 0x440   : > { %v888_v27 = vpop.f32.mrf.mxu0 }
 0x441   : > { %718 = vst [vmem:[%s314_s15] sm:$0x3] %v713_v26 }
 0x442   : > { %v715_v28 = vpop.f32.mrf.mxu0 }
 0x443   : > { %1022 = shalt.err (!%p1019_p6)
}
 0x444   : > { %s1023_s10 = scalar_lea.hbm %s1424_s14, 32  ;;  %s1027_s13 = scalar_lea.hbm %s1508_s16, 128 }
 0x445   : > { %p1024_p7 = scmp.ne.s32.totalorder %s1424_s14, %s1023_s10  ;;  %p1028_p13 = scmp.lt.s32.totalorder %s1424_s14, %s1508_s16 }
 0x446   : > { %p1029_p1 = scmp.lt.s32.totalorder %s1027_s13, %s1023_s10 }
 0x447   : > { %p1025_p10 = pnand %p1024_p7, %p1221_p9 }
 0x448   : > { %p1030_p8 = por %p1029_p1, %p1028_p13 }
 0x449   : > { %p1026_p11 = pneg %p1025_p10 }
 0x44b   : > { %p1031_p0 = pnand %p1030_p8, %p1026_p11 }
 0x44d   : > { %1034 = shalt.err (!%p1031_p0)
}
 0x44e   : > { %892 = dma.vmem_to_hbm [thread:$0]  (%p1221_p9), %s1426_s12, 32, %s1424_s14, %s720_s27   ;;  %v889_v29 = vpop.f32.mrf.mxu0 }
 0x44f PF: > { %s1509_s5 = sld [smem:[#allocation8_spill]]  ;;  %p903_p2 = scmp.ge.s32.totalorder %s1105_s8, 2 }
 0x451   : > { %p899_p4 = pnand %p903_p2, %p1227_p12 }
 0x453   : > { %p900_p5 = pneg %p899_p4 }
 0x455   : > { %s747_s15 = sand.u32 1, %s1509_s5  }
 0x456   : > { %s748_s29 = scalar_lea.sflag [#allocation4], %s747_s15 }
 0x457   : > { %1072 = dma.done.wait (%p900_p5), %s748_s29, 32  }
 0x458   : > { %1074 = vsyncadd (%p900_p5), %s748_s29, 4294967264  ;;  %s23_s8 = sadd.s32 1, %s1105_s8   ;;  %s1510_s27 = sld [smem:[#allocation9_spill]] }
 0x459   : > { %p20_p3 = scmp.ge.s32.totalorder %s23_s8, 6   ;;  %s1511_s29 = sld [smem:[#allocation10_spill]] }
 0x45a   : > { %s1512_s17 = sld [smem:[#allocation11_spill]]  ;;  %s1513_s24 = smov %s1081_s25 }
 0x45b   : > { %s1514_s25 = smov %s1085_s26  ;;  %s1515_s26 = smov %s1234_s22 }
 0x45c   : > { %s1516_s28 = smov %s1101_s30  ;;  %22 = sbr.rel (!%p20_p3) target bundleno = 10 (0xa), region = 93 }
 0x460   : > { %s1517_s30 = smov %s1512_s17 }
 0x461   :  { %753 = vsyncpa [#allocation3], 1 }
 0x462   :  { %755 = vsyncpa [#allocation3 + $0x1], 1 }
 0x463   :  { %756 = vsyncpa [#allocation4], 1 }
 0x464   :  { %758 = vsyncpa [#allocation4 + $0x1], 1 }

</bundles_post_ra>
